<compile_context>
chip_gen: v5e
topology: v5e:2x2
jax: 0.10.0
libtpu: 0.0.40
codegen_flags: <defaults>
</compile_context>

<pallas_src>
import functools

import jax
import jax.numpy as jnp
from jax import lax
from jax.experimental import pallas as pl
from jax.experimental.pallas import tpu as pltpu


def _round_up(x, m):
    return ((x + m - 1) // m) * m


# ---------------------------------------------------------------------------
# K-tiled matmul (+ fused bias epilogue)
# ---------------------------------------------------------------------------

def _matmul_bias_kernel(x_ref, w_ref, b_ref, o_ref, acc_ref):
    k_idx = pl.program_id(2)

    @pl.when(k_idx == 0)
    def _init():
        acc_ref[...] = jnp.zeros_like(acc_ref)

    acc_ref[...] += jnp.dot(x_ref[...], w_ref[...],
                            preferred_element_type=jnp.float32)

    @pl.when(k_idx == pl.num_programs(2) - 1)
    def _finalize():
        o_ref[...] = (acc_ref[...] + b_ref[...]).astype(o_ref.dtype)


def pallas_matmul(x, w, bias=None, *, block_m=512, block_n=256, block_k=512,
                  mxu_dtype=jnp.bfloat16, out_dtype=None):
    """x: (M, K), w: (K, N) -> (M, N) [+ bias], f32 accumulation on the MXU."""
    assert block_m % 8 == 0 and block_n % 128 == 0 and block_k % 128 == 0
    M, K = x.shape
    K2, N = w.shape
    assert K == K2, f"matmul shape mismatch: {x.shape} @ {w.shape}"
    out_dtype = out_dtype if out_dtype is not None else x.dtype

    # Tiles: full-extent blocks when a dim fits in one block (no padding
    # needed, "equal full dim" satisfies the (8,128) rule); otherwise aligned
    # blocks with partial edge blocks handled by Pallas (rows/cols are
    # independent, garbage stays confined to out-of-bounds output).
    tm = M if M <= block_m else block_m
    tn = N if N <= block_n else block_n
    if K <= block_k:
        tk, Kp = K, K
    else:
        tk, Kp = block_k, _round_up(K, block_k)

    # v7x megacore occupancy: avoid a degenerate 1x1 parallel grid when there
    # are enough rows to split across the two TensorCores.
    if pl.cdiv(M, tm) * pl.cdiv(N, tn) == 1 and M >= 16:
        tm = _round_up((M + 1) // 2, 8)

    xin = x.astype(mxu_dtype)
    win = w.astype(mxu_dtype)
    if Kp != K:
        # K raggedness must be zero-padded (both operands contribute to every
        # output element along K).
        xin = jnp.pad(xin, ((0, 0), (0, Kp - K)))
        win = jnp.pad(win, ((0, Kp - K), (0, 0)))
    if bias is None:
        b = jnp.zeros((1, N), dtype=jnp.float32)
    else:
        b = bias.astype(jnp.float32).reshape(1, N)

    grid = (pl.cdiv(M, tm), pl.cdiv(N, tn), Kp // tk)
    item_in = jnp.dtype(mxu_dtype).itemsize
    flops = 2 * M * N * Kp
    bytes_accessed = (M * Kp * item_in * grid[1]           # x re-read per N tile
                      + Kp * N * item_in * grid[0]         # w re-read per M tile
                      + M * N * jnp.dtype(out_dtype).itemsize)

    return pl.pallas_call(
        _matmul_bias_kernel,
        out_shape=jax.ShapeDtypeStruct((M, N), out_dtype),
        grid_spec=pltpu.PrefetchScalarGridSpec(
            num_scalar_prefetch=0,
            grid=grid,
            in_specs=[
                pl.BlockSpec((tm, tk), lambda i, j, k: (i, k)),
                pl.BlockSpec((tk, tn), lambda i, j, k: (k, j)),
                pl.BlockSpec((1, tn), lambda i, j, k: (0, j)),
            ],
            out_specs=pl.BlockSpec((tm, tn), lambda i, j, k: (i, j)),
            scratch_shapes=[pltpu.VMEM((tm, tn), jnp.float32)],
        ),
        compiler_params=pltpu.CompilerParams(
            dimension_semantics=("parallel", "parallel", "arbitrary"),
            vmem_limit_bytes=32 * 1024 * 1024,
        ),
        cost_estimate=pl.CostEstimate(flops=flops, transcendentals=0,
                                      bytes_accessed=bytes_accessed),
    )(xin, win, b)


# ---------------------------------------------------------------------------
# Flash attention (online softmax, head groups selected by BlockSpec columns)
# ---------------------------------------------------------------------------

def _flash_attn_kernel(q_ref, k_ref, v_ref, o_ref, m_ref, l_ref, acc_ref, *,
                       hpb, dh, q_off, k_off, v_off, mask_last, kv_rem):
    kv_idx = pl.program_id(3)
    num_kv = pl.num_programs(3)

    @pl.when(kv_idx == 0)
    def _init():
        m_ref[...] = jnp.full_like(m_ref, -jnp.inf)
        l_ref[...] = jnp.zeros_like(l_ref)
        acc_ref[...] = jnp.zeros_like(acc_ref)

    q = q_ref[0]   # (tq,  block_cols)
    k = k_ref[0]   # (tkv, block_cols)
    v = v_ref[0]   # (tkv, block_cols)

    def update(h, s, vh):
        # Online softmax update for head h of this head group.
        # NOTE: the last kv tile always contains >=1 valid column, so m_new is
        # finite for valid q rows and alpha never hits exp(-inf - (-inf)).
        m_prev = m_ref[:, h:h + 1]
        m_new = jnp.maximum(m_prev, jnp.max(s, axis=-1, keepdims=True))
        alpha = jnp.exp(m_prev - m_new)
        p = jnp.exp(s - m_new)
        l_ref[:, h:h + 1] = alpha * l_ref[:, h:h + 1] + jnp.sum(
            p, axis=-1, keepdims=True)
        acc_ref[:, h * dh:(h + 1) * dh] = (
            alpha * acc_ref[:, h * dh:(h + 1) * dh]
            + jnp.dot(p.astype(vh.dtype), vh, preferred_element_type=jnp.float32))
        m_ref[:, h:h + 1] = m_new

    for h in range(hpb):   # static, small (heads per 128-lane group)
        qh = q[:, q_off + h * dh: q_off + (h + 1) * dh]
        kh = k[:, k_off + h * dh: k_off + (h + 1) * dh]
        vh = v[:, v_off + h * dh: v_off + (h + 1) * dh]
        # Softmax scale is pre-folded into q (w_q scaled on the host side).
        s = lax.dot_general(qh, kh, (((1,), (1,)), ((), ())),
                            preferred_element_type=jnp.float32)   # (tq, tkv)
        if mask_last:
            @pl.when(kv_idx < num_kv - 1)
            def _full(h=h, s=s, vh=vh):
                update(h, s, vh)

            @pl.when(kv_idx == num_kv - 1)
            def _partial(h=h, s=s, vh=vh):
                col = lax.broadcasted_iota(jnp.int32, s.shape, 1)
                row = lax.broadcasted_iota(jnp.int32, vh.shape, 0)
                s_m = jnp.where(col < kv_rem, s, -jnp.inf)
                v_m = jnp.where(row < kv_rem, vh, jnp.zeros_like(vh))
                update(h, s_m, v_m)
        else:
            update(h, s, vh)

    @pl.when(kv_idx == num_kv - 1)
    def _finalize():
        inv_l = pl.reciprocal(l_ref[...], approx=True)   # (tq, hpb)
        for h in range(hpb):
            o_ref[0, :, h * dh:(h + 1) * dh] = (
                acc_ref[:, h * dh:(h + 1) * dh] * inv_l[:, h:h + 1]
            ).astype(o_ref.dtype)


def pallas_flash_attention(q_src, kv_src, *, heads, dim_head,
                           q_col, k_col, v_col,
                           block_q=256, block_kv=512, out_dtype=None):
    """q_src: (B, N, Cq) holding q columns at q_col..q_col+inner in 'b n (h d)'.
    kv_src: (B, M, Ckv) holding k at k_col and v at v_col. Returns (B, N, inner).
    """
    B, N, Cq = q_src.shape
    Bk, M, Ckv = kv_src.shape
    assert Bk == B
    inner = heads * dim_head
    out_dtype = out_dtype if out_dtype is not None else q_src.dtype

    # Heads per block: smallest head group whose lane width is a 128-multiple.
    hpb = heads
    for cand in range(1, heads + 1):
        if heads % cand == 0 and (cand * dim_head) % 128 == 0:
            hpb = cand
            break
    hg = heads // hpb
    bq = hpb * dim_head               # lane width of one head group
    aligned = (bq % 128 == 0)

    # Sequence tiles (full-length block when the sequence fits one block).
    tq = N if N <= block_q else block_q
    tkv = M if M <= block_kv else block_kv
    n_q = pl.cdiv(N, tq)
    n_kv = pl.cdiv(M, tkv)
    mask_last = (M % tkv) != 0                      # only ragged kv pays a mask
    kv_rem = M - (n_kv - 1) * tkv

    if aligned:
        assert q_col % bq == 0 and k_col % bq == 0 and v_col % bq == 0
        qb, kb, vb = q_col // bq, k_col // bq, v_col // bq
        q_spec = pl.BlockSpec((1, tq, bq), lambda b, g, qi, ki: (b, qi, qb + g))
        k_spec = pl.BlockSpec((1, tkv, bq), lambda b, g, qi, ki: (b, ki, kb + g))
        v_spec = pl.BlockSpec((1, tkv, bq), lambda b, g, qi, ki: (b, ki, vb + g))
        q_off = k_off = v_off = 0
    else:
        # Tiny / non-128-aligned head configs (hg == 1): blocks span the full
        # feature dim (equal-to-array-dim blocks satisfy the (8,128) rule);
        # head columns are picked with static lane slices inside the kernel.
        q_spec = pl.BlockSpec((1, tq, Cq), lambda b, g, qi, ki: (b, qi, 0))
        k_spec = pl.BlockSpec((1, tkv, Ckv), lambda b, g, qi, ki: (b, ki, 0))
        v_spec = pl.BlockSpec((1, tkv, Ckv), lambda b, g, qi, ki: (b, ki, 0))
        q_off, k_off, v_off = q_col, k_col, v_col

    o_spec = pl.BlockSpec((1, tq, bq), lambda b, g, qi, ki: (b, qi, g))

    kernel = functools.partial(_flash_attn_kernel, hpb=hpb, dh=dim_head,
                               q_off=q_off, k_off=k_off, v_off=v_off,
                               mask_last=mask_last, kv_rem=kv_rem)

    flops = 4 * B * heads * N * M * dim_head
    bytes_accessed = (q_src.size * q_src.dtype.itemsize
                      + 2 * kv_src.size * kv_src.dtype.itemsize * n_q  # K/V per q tile
                      + B * N * inner * jnp.dtype(out_dtype).itemsize)

    return pl.pallas_call(
        kernel,
        out_shape=jax.ShapeDtypeStruct((B, N, inner), out_dtype),
        grid_spec=pltpu.PrefetchScalarGridSpec(
            num_scalar_prefetch=0,
            grid=(B, hg, n_q, n_kv),
            in_specs=[q_spec, k_spec, v_spec],
            out_specs=o_spec,
            scratch_shapes=[
                pltpu.VMEM((tq, hpb), jnp.float32),   # running max m
                pltpu.VMEM((tq, hpb), jnp.float32),   # running denom l
                pltpu.VMEM((tq, bq), jnp.float32),    # output accumulator
            ],
        ),
        compiler_params=pltpu.CompilerParams(
            dimension_semantics=("parallel", "parallel", "parallel", "arbitrary"),
            vmem_limit_bytes=32 * 1024 * 1024,
        ),
        cost_estimate=pl.CostEstimate(flops=flops,
                                      transcendentals=B * heads * N * M,
                                      bytes_accessed=bytes_accessed),
    )(q_src, kv_src, kv_src)


# ---------------------------------------------------------------------------
# C0_Attention forward (JAX glue + Pallas kernels)
# ---------------------------------------------------------------------------

def c0_attention_init(key, dim, heads=8, dim_head=64, dtype=jnp.float32):
    """Deterministic parameter init. Weights stored as (in_features, out_features)."""
    inner_dim = dim_head * heads
    k_q, k_kv, k_out = jax.random.split(key, 3)

    def lin(k, fan_in, fan_out):
        bound = 1.0 / (fan_in ** 0.5)
        return jax.random.uniform(k, (fan_in, fan_out), dtype=dtype,
                                  minval=-bound, maxval=bound)

    return {
        "w_q": lin(k_q, dim, inner_dim),
        "w_kv": lin(k_kv, dim, inner_dim * 2),
        "w_out": lin(k_out, inner_dim, dim),
        "b_out": jnp.zeros((dim,), dtype=dtype),
    }


def c0_attention_forward(params, x, heads, dim_head, context=None,
                         kv_include_self=False, mxu_dtype=jnp.bfloat16):
    """x: (B, N, DIM) -> (B, N, DIM). Matches C0_Attention.forward (eval)."""
    # TODO(synk): nn.Dropout is identity here (p=0.0 / eval mode), so it is omitted.
    B, N, DIM = x.shape
    inner = heads * dim_head
    scale = dim_head ** (-0.5)

    self_attn = (context is None) and (not kv_include_self)
    if self_attn:
        # Fused q/k/v projection: one pass over x; softmax scale folded into w_q.
        w_qkv = jnp.concatenate([params["w_q"] * scale, params["w_kv"]], axis=1)
        qkv = pallas_matmul(x.reshape(B * N, DIM), w_qkv,
                            mxu_dtype=mxu_dtype, out_dtype=mxu_dtype)
        qkv = qkv.reshape(B, N, 3 * inner)
        o = pallas_flash_attention(qkv, qkv, heads=heads, dim_head=dim_head,
                                   q_col=0, k_col=inner, v_col=2 * inner,
                                   out_dtype=mxu_dtype)
    else:
        ctx = x if context is None else context
        if kv_include_self:
            ctx = jnp.concatenate((x, ctx), axis=1)
        M = ctx.shape[1]
        q = pallas_matmul(x.reshape(B * N, DIM), params["w_q"] * scale,
                          mxu_dtype=mxu_dtype,
                          out_dtype=mxu_dtype).reshape(B, N, inner)
        kv = pallas_matmul(ctx.reshape(B * M, DIM), params["w_kv"],
                           mxu_dtype=mxu_dtype,
                           out_dtype=mxu_dtype).reshape(B, M, 2 * inner)
        o = pallas_flash_attention(q, kv, heads=heads, dim_head=dim_head,
                                   q_col=0, k_col=0, v_col=inner,
                                   out_dtype=mxu_dtype)

    # Head merge is free: attention output is already in 'b n (h d)' layout.
    out = pallas_matmul(o.reshape(B * N, inner), params["w_out"],
                        bias=params["b_out"], mxu_dtype=mxu_dtype,
                        out_dtype=x.dtype)
    return out.reshape(B, N, DIM)


# ---------------------------------------------------------------------------
# Pure-JAX reference (for correctness check)
# ---------------------------------------------------------------------------

def c0_attention_reference(params, x, heads, dim_head, context=None,
                           kv_include_self=False):
    B, N, DIM = x.shape
    inner_dim = heads * dim_head
    scale = dim_head ** (-0.5)

    ctx = x if context is None else context
    if kv_include_self:
        ctx = jnp.concatenate((x, ctx), axis=1)
    M = ctx.shape[1]

    q = x @ params["w_q"]
    kv = ctx @ params["w_kv"]
    k, v = kv[..., :inner_dim], kv[..., inner_dim:]

    def split(t, S):
        return t.reshape(B, S, heads, dim_head).transpose(0, 2, 1, 3)

    qh, kh, vh = split(q, N), split(k, M), split(v, M)
    dots = jnp.einsum("bhid,bhjd->bhij", qh, kh) * scale
    attn = jax.nn.softmax(dots, axis=-1)
    o = jnp.einsum("bhij,bhjd->bhid", attn, vh)
    o = o.transpose(0, 2, 1, 3).reshape(B, N, inner_dim)
    return o @ params["w_out"] + params["b_out"]


# ---------------------------------------------------------------------------
# main
# ---------------------------------------------------------------------------

if __name__ == "__main__":
    B, N, DIM = 2, 8, 32
    HEADS, DIM_HEAD = 2, 8   # inner_dim = 16

    key = jax.random.PRNGKey(0)
    k_param, k_x, k_ctx = jax.random.split(key, 3)

    params = c0_attention_init(k_param, DIM, heads=HEADS, dim_head=DIM_HEAD)
    x = jax.random.normal(k_x, (B, N, DIM), dtype=jnp.float32)

    # --- self-attention path (fused qkv projection) ---
    out = c0_attention_forward(params, x, HEADS, DIM_HEAD)
    out = jax.block_until_ready(out)
    ref = c0_attention_reference(params, x, HEADS, DIM_HEAD)
    assert out.shape == (B, N, DIM)
    assert not bool(jnp.any(jnp.isnan(out)))
    # bf16 MXU operands + approx reciprocal -> relaxed tolerance vs f32 reference.
    assert jnp.allclose(out, ref, atol=5e-2, rtol=5e-2), "self-attn mismatch vs reference"

    # --- cross-attention path (M != N, kv_include_self) ---
    ctx = jax.random.normal(k_ctx, (B, 12, DIM), dtype=jnp.float32)
    out_x = c0_attention_forward(params, x, HEADS, DIM_HEAD,
                                 context=ctx, kv_include_self=True)
    out_x = jax.block_until_ready(out_x)
    ref_x = c0_attention_reference(params, x, HEADS, DIM_HEAD,
                                   context=ctx, kv_include_self=True)
    assert out_x.shape == (B, N, DIM)
    assert not bool(jnp.any(jnp.isnan(out_x)))
    assert jnp.allclose(out_x, ref_x, atol=5e-2, rtol=5e-2), "cross-attn mismatch vs reference"

    print("KERNEL_OK")
</pallas_src>

<mosaic_0001>
module attributes {stable_mosaic.version = 11 : i64} {
  func.func @_matmul_bias_kernel(%arg0: i32, %arg1: i32, %arg2: i32, %arg3: memref<8x32xbf16, #tpu.memory_space<vmem>>, %arg4: memref<32x48xbf16, #tpu.memory_space<vmem>>, %arg5: memref<1x48xf32, #tpu.memory_space<vmem>>, %arg6: memref<8x48xbf16, #tpu.memory_space<vmem>>, %arg7: memref<8x48xf32, #tpu.memory_space<vmem>>) attributes {dimension_semantics = [#tpu.dimension_semantics<parallel>, #tpu.dimension_semantics<parallel>, #tpu.dimension_semantics<arbitrary>], iteration_bounds = array<i64: 2, 1, 1>, scalar_prefetch = 0 : i64, scratch_operands = 1 : i64, tpu.core_type = #tpu.core_type<tc>, window_params = [{transform_indices = @transform_0, window_bounds = array<i64: 8, 32>}, {transform_indices = @transform_1, window_bounds = array<i64: 32, 48>}, {transform_indices = @transform_2, window_bounds = array<i64: 1, 48>}, {transform_indices = @transform_3, window_bounds = array<i64: 8, 48>}]} {
    %c0_i32 = arith.constant 0 : i32
    %0 = arith.cmpi eq, %arg2, %c0_i32 : i32
    %1 = arith.extui %0 : i1 to i32
    %c0_i32_0 = arith.constant 0 : i32
    %2 = arith.cmpi ne, %1, %c0_i32_0 : i32
    scf.if %2 {
      %cst_10 = arith.constant 0.000000e+00 : f32
      %12 = vector.broadcast %cst_10 : f32 to vector<8x48xf32>
      %c0_11 = arith.constant 0 : index
      %c0_12 = arith.constant 0 : index
      %13 = vector.load %arg7[%c0_11, %c0_12] : memref<8x48xf32, #tpu.memory_space<vmem>>, vector<8x48xf32>
      tpu.vector_store %arg7[%c0_11, %c0_12], %12 {strides = array<i32>} : memref<8x48xf32, #tpu.memory_space<vmem>>, vector<8x48xf32>,
    } else {
    }
    %c0 = arith.constant 0 : index
    %c0_1 = arith.constant 0 : index
    %3 = vector.load %arg7[%c0, %c0_1] : memref<8x48xf32, #tpu.memory_space<vmem>>, vector<8x48xf32>
    %c0_2 = arith.constant 0 : index
    %c0_3 = arith.constant 0 : index
    %4 = vector.load %arg3[%c0_2, %c0_3] : memref<8x32xbf16, #tpu.memory_space<vmem>>, vector<8x32xbf16>
    %c0_4 = arith.constant 0 : index
    %c0_5 = arith.constant 0 : index
    %5 = vector.load %arg4[%c0_4, %c0_5] : memref<32x48xbf16, #tpu.memory_space<vmem>>, vector<32x48xbf16>
    %cst = arith.constant dense<0.000000e+00> : vector<8x48xf32>
    %6 = tpu.matmul %4, %5, %cst {dimension_numbers = #tpu.dot_dimension_numbers<[1], [0], [0], [1], [0, 0, 1, 1], [], []>} : vector<8x32xbf16>, vector<32x48xbf16>, vector<8x48xf32> -> vector<8x48xf32>
    %7 = arith.addf %3, %6 : vector<8x48xf32>
    %c0_6 = arith.constant 0 : index
    %c0_7 = arith.constant 0 : index
    %8 = vector.load %arg7[%c0_6, %c0_7] : memref<8x48xf32, #tpu.memory_space<vmem>>, vector<8x48xf32>
    tpu.vector_store %arg7[%c0_6, %c0_7], %7 {strides = array<i32>} : memref<8x48xf32, #tpu.memory_space<vmem>>, vector<8x48xf32>,
    %c0_i32_8 = arith.constant 0 : i32
    %9 = arith.cmpi eq, %arg2, %c0_i32_8 : i32
    %10 = arith.extui %9 : i1 to i32
    %c0_i32_9 = arith.constant 0 : i32
    %11 = arith.cmpi ne, %10, %c0_i32_9 : i32
    scf.if %11 {
      %c0_10 = arith.constant 0 : index
      %c0_11 = arith.constant 0 : index
      %12 = vector.load %arg7[%c0_10, %c0_11] : memref<8x48xf32, #tpu.memory_space<vmem>>, vector<8x48xf32>
      %c0_12 = arith.constant 0 : index
      %c0_13 = arith.constant 0 : index
      %13 = vector.load %arg5[%c0_12, %c0_13] : memref<1x48xf32, #tpu.memory_space<vmem>>, vector<1x48xf32>
      %14 = vector.broadcast %13 : vector<1x48xf32> to vector<8x48xf32>
      %15 = arith.addf %12, %14 : vector<8x48xf32>
      %16 = arith.truncf %15 : vector<8x48xf32> to vector<8x48xbf16>
      %c0_14 = arith.constant 0 : index
      %c0_15 = arith.constant 0 : index
      %17 = vector.load %arg6[%c0_14, %c0_15] : memref<8x48xbf16, #tpu.memory_space<vmem>>, vector<8x48xbf16>
      tpu.vector_store %arg6[%c0_14, %c0_15], %16 {strides = array<i32>} : memref<8x48xbf16, #tpu.memory_space<vmem>>, vector<8x48xbf16>,
    } else {
    }
    return
  }
  func.func @transform_0(%arg0: i32, %arg1: i32, %arg2: i32) -> (i32, i32) {
    %c0_i32 = arith.constant 0 : i32
    return %arg0, %arg2 : i32, i32
  }
  func.func @transform_1(%arg0: i32, %arg1: i32, %arg2: i32) -> (i32, i32) {
    %c0_i32 = arith.constant 0 : i32
    return %arg2, %arg1 : i32, i32
  }
  func.func @transform_2(%arg0: i32, %arg1: i32, %arg2: i32) -> (i32, i32) {
    %c0_i32 = arith.constant 0 : i32
    %c0_i32_0 = arith.constant 0 : i32
    return %c0_i32, %arg1 : i32, i32
  }
  func.func @transform_3(%arg0: i32, %arg1: i32, %arg2: i32) -> (i32, i32) {
    %c0_i32 = arith.constant 0 : i32
    return %arg0, %arg1 : i32, i32
  }
}

</mosaic_0001>

<bundles_post_ra>
// kernel: tpu_custom_call.1
= control target key start
LH: loop header
LB: loop body
LE: loop exit
PB: predicated region body
PF: predicated region fallthrough
CT: control target
= control target key end

     0   :  { %8 = vsyncpa [#allocation4], 0  ;;  %s860_s0 = inlined_call_operand.hbm [shape: bf16[16,32], index: 0, kind: input, shape index: {}]   ;;  %s861_s1 = inlined_call_operand.hbm [shape: bf16[32,48], index: 1, kind: input, shape index: {}]   ;;  %s862_s2 = inlined_call_operand.vmem [shape: f32[1,48], index: 2, kind: input, shape index: {}]   ;;  %s863_s3 = inlined_call_operand.hbm [shape: bf16[16,48], index: 3, kind: output, shape index: {}]  }
   0x1   :  { %10 = vsyncpa [#allocation4 + $0x1], 0 }
   0x2   :  { %11 = vsyncpa [#allocation7], 0 }
   0x3   :  { %12 = vsyncpa [#allocation5], 0 }
   0x4   :  { %14 = vsyncpa [#allocation5 + $0x1], 0  ;;  %s714_s12 = smov 0   ;;  %s716_s13 = smov 0  }
   0x5   :  { %s718_s14 = smov 0   ;;  %s720_s15 = smov 0  }
   0x6   :  { %s722_s16 = smov 0   ;;  %s724_s17 = smov 0  }
   0x7 LB: > { %s438_s18 = sadd.s32 4294967295, %s688_s17   ;;  %p440_p0 = scmp.ge.s32.totalorder %s688_s17, 1  ;;  %s688_s17 = sphi %s724_s17, %s20_s17   ;;  %s684_s16 = sphi %s722_s16, %s874_s16   ;;  %s680_s15 = sphi %s720_s15, %s873_s15   ;;  %s676_s14 = sphi %s718_s14, %s872_s14   ;;  %s672_s13 = sphi %s716_s13, %s871_s13   ;;  %s668_s12 = sphi %s714_s12, %s870_s12  }
   0x8   : > { %p746_p1 = scmp.eq.s32.totalorder %s438_s18, 0  ;;  %p154_p2 = scmp.lt.s32.totalorder %s688_s17, 3 }
   0x9   : > { %s169_s22 = sshll.u32 %s861_s1, 4  ;;  %s690_s24 = smov [#allocation6]   ;;  %s170_s22 = int_to_ptr.hbm [resolvable:$true] %s169_s22 }
   0xa   : > { %p754_p3 = pnand %p440_p0, %p154_p2  ;;  %s171_s25 = sshll.u32 %s690_s24, 4  ;;  %s172_s25 = int_to_ptr.vmem [resolvable:$true] %s171_s25 }
   0xb   : > { %p443_p6 = scmp.ge.s32.totalorder %s688_s17, 2  ;;  %s691_s26 = smov 64  }
   0xc   : > { %p473_p4 = pneg %p754_p3  ;;  %s692_s27 = smov 4  }
   0xd   : > { %s439_s28 = sadd.s32 4294967294, %s688_s17   ;;  %s39_s29 = sadd.s32 1, %s684_s16 }
   0xe   : > { %p474_p5 = pnand %p473_p4, %p746_p1  ;;  %s48_s30 = sadd.s32 1, %s676_s14 }
   0xf   : > { %p41_p7 = scmp.ge.s32.totalorder %s39_s29, 2  ;;  %p55_p8 = scmp.ne.s32.totalorder %s676_s14, %s672_s13 }
  0x10   : > { %476 = dma.hbm_to_vmem [thread:$0]  (!%p474_p5), %s170_s22, 256, %s172_s25, [#allocation7], %s691_s26, %s691_s26, %s692_s27  }
  0x11   : > { %p56_p9 = scmp.eq.s32.totalorder %s688_s17, 0  ;;  %p61_p10 = scmp.ne.s32.totalorder %s672_s13, %s668_s12 }
  0x12   : > { %s876_s29 = smov (%p41_p7, %s39_s29), 0  ;;  %p141_p13 = scmp.eq.s32.totalorder %s438_s18, 1 }
  0x13   : > { %p773_p11 = por %p56_p9, %p55_p8  ;;  %p779_p12 = por %p746_p1, %p61_p10 }
  0x14   : > { %s43_s6 = ssub.s32 %s684_s16, %s876_s29  ;;  %p147_p2 = scmp.eq.s32.totalorder %s439_s28, 1 }
  0x15   : > { %p46_p0 = scmp.eq.s32.totalorder %s43_s6, 0  ;;  %p785_p4 = por %p141_p13, %p55_p8 }
  0x16   : > { %p486_p5 = scmp.lt.s32.totalorder %s688_s17, 2  ;;  %p793_p7 = por %p147_p2, %p61_p10 }
  0x17   : > { %s791_s8 = scalar_select %p46_p0, %s676_s14, %s48_s30  }
  0x18   : > { %s191_s10 = sand.u32 1, %s676_s14   ;;  %s445_s20 = sshll.u32 %s684_s16, 2 }
  0x19   : > { %s444_s11 = sshll.u32 %s191_s10, 2  ;;  %s200_s18 = scalar_lea.hbm %s860_s0, %s445_s20 }
  0x1a   : > { %s195_s24 = scalar_lea.vmem [#allocation3], %s444_s11  ;;  %s202_s26 = sshll.u32 %s200_s18, 4  ;;  %s203_s26 = int_to_ptr.hbm [resolvable:$true] %s202_s26 }
  0x1b   : > { %s204_s25 = sshll.u32 %s195_s24, 4  ;;  %p478_p8 = pnand %p486_p5, %p773_p11  ;;  %s205_s25 = int_to_ptr.vmem [resolvable:$true] %s204_s25 }
  0x1c   : > { %s192_s27 = scalar_lea.sflag [#allocation4], %s191_s10  ;;  %213 = sbr.rel (%p754_p3) target bundleno = 187 (0xbb), region = 32 }
  0x1d   : > { %480 = dma.hbm_to_vmem [thread:$0]  (!%p478_p8), %s203_s26, 64, %s205_s25, %s192_s27  }
  0x1e   : > { %s807_s28 = sand.u32 (!%p754_p3), 1, %s672_s13  }
  0x1f   : > { %s447_s30 = sshll.u32 (!%p754_p3), %s807_s28, 2  ;;  %s216_s6 = scalar_lea.sflag (!%p754_p3), [#allocation4], %s807_s28 }
  0x20   : > { %s219_s11 = scalar_lea.vmem (!%p754_p3), [#allocation3], %s447_s30 }
  0x21   : > { %655 = dma.done.wait (%p779_p12), %s216_s6, 64  }
  0x22   : > { %657 = vsyncadd (%p779_p12), %s216_s6, 4294967232 }
  0x23   : > { %659 = dma.done.wait (%p746_p1), [#allocation7], 256  }
  0x24   : > { %661 = vsyncadd (%p746_p1), [#allocation7], 4294967040  ;;  %vm260_vm0 = vcmask 392192   ;;  %v693_v0 = vmov 0.0   ;;  %v464_v1 = vld [vmem:[#allocation6 + $0x8] sm:$0xff]  ;;  %v463_v2 = vld [vmem:[#allocation6] sm:$0xff] }
  0x25   : > { %261 = vst.msk [vmem:[#allocation2] sm:$0xff] %vm260_vm0, %v693_v0  ;;  %290 = vmatpush.bf16.msra.mxu0 %v464_v1  ;;  %v263_v3 = vld [vmem:[%s219_s11] sm:$0xf]  ;;  %vm280_vm1 = vcmask 261120   ;;  %s460_s23 = sshll.u32 %s680_s15, 2  ;;  %s250_s21 = scalar_lea.vmem [#allocation8], %s447_s30 }
  0x26   : > { %v541_v7 = vld [vmem:[%s862_s2] ss:$0 sm:$0xff]  ;;  %s324_s20 = scalar_lea.hbm %s863_s3, %s460_s23  ;;  %s326_s22 = sshll.u32 %s250_s21, 4  ;;  %vm310_vm2 = vcmask 388096   ;;  %s327_s22 = int_to_ptr.vmem [resolvable:$true] %s326_s22 }
  0x27   : > { %s328_s18 = sshll.u32 %s324_s20, 4  ;;  %s313_s15 = scalar_lea.sflag [#allocation5], %s807_s28  ;;  %s329_s18 = int_to_ptr.hbm [resolvable:$true] %s328_s18 }
  0x28   : > { %s616_s24 = sshra.s32 %s329_s18, 4  ;;  %s622_s30 = scalar_lea.hbm %s863_s3, 8  ;;  %s617_s24 = int_to_ptr.hbm [resolvable:$true] %s616_s24 }
  0x29   : > { %291 = vmatpush.bf16.msra.mxu0 %v463_v2  ;;  %s618_s25 = scalar_lea.hbm %s617_s24, 4  ;;  %p623_p10 = scmp.lt.s32.totalorder %s617_s24, %s863_s3 }
  0x2a   : > { %p619_p1 = scmp.ne.s32.totalorder %s617_s24, %s618_s25  ;;  %p624_p11 = scmp.lt.s32.totalorder %s622_s30, %s618_s25 }
  0x2c   : > { %458 = vmatmul.msk.bf16.vlgmr.msra.gmra.mxu0 %vm280_vm1, %v263_v3  ;;  %v262_v4 = vld [vmem:[#allocation2] sm:$0xff]  ;;  %p620_p3 = pnand %p619_p1, %p785_p4  ;;  %p625_p12 = por %p624_p11, %p623_p10 }
  0x2e   : > { %p621_p9 = pneg %p620_p3 }
  0x30   : > { %p626_p13 = pnand %p625_p12, %p621_p9 }
  0xa9   : > { %v293_v5 = vpop.f32.mrf.mxu0 }
  0xaa   : > { %v297_v6 = vadd.f32 %v293_v5, %v262_v4 }
  0xac   : > { %299 = vst.msk [vmem:[#allocation2] sm:$0xff] %vm260_vm0, %v297_v6 }
  0xb1   : > { %v295_v8 = vpop.f32.mrf.mxu0 }
  0xb3   : > { %v303_v9 = vld [vmem:[#allocation2] sm:$0xff] }
  0xb4   : > { %v308_v10 = vadd.f32 %v541_v7, %v303_v9 }
  0xb6   : > { %v309_v11 = vpack.c.bf16 %v308_v10, %v308_v10 }
  0xb8   : > { %311 = vst.msk [vmem:[%s250_s21] sm:$0xf] %vm310_vm2, %v309_v11 }
  0xb9   : > { %629 = shalt.err (!%p626_p13)
}
  0xba   : > { %471 = dma.vmem_to_hbm [thread:$0]  (%p785_p4), %s327_s22, 64, %s329_s18, %s313_s15  }
  0xbb PF: > { %s340_s28 = sand.u32 1, %s668_s12   ;;  %p482_p0 = pnand %p443_p6, %p793_p7 }
  0xbc   : > { %s341_s23 = scalar_lea.sflag [#allocation5], %s340_s28 }
  0xbd   : > { %p483_p2 = pneg %p482_p0 }
  0xbf   : > { %663 = dma.done.wait (%p483_p2), %s341_s23, 64  }
  0xc0   : > { %665 = vsyncadd (%p483_p2), %s341_s23, 4294967232  ;;  %s20_s17 = sadd.s32 1, %s688_s17   ;;  %s870_s12 = smov %s672_s13 }
  0xc1   : > { %p17_p5 = scmp.ge.s32.totalorder %s20_s17, 4   ;;  %s871_s13 = smov %s676_s14 }
  0xc2   : > { %s872_s14 = smov %s791_s8  ;;  %s873_s15 = smov %s684_s16 }
  0xc3   : > { %s874_s16 = smov %s876_s29  ;;  %19 = sbr.rel (!%p17_p5) target bundleno = 7 (0x7), region = 93 }
  0xc8   :  { %347 = vsyncpa [#allocation4], 1 }
  0xc9   :  { %349 = vsyncpa [#allocation4 + $0x1], 1 }
  0xca   :  { %350 = vsyncpa [#allocation7], 1 }
  0xcb   :  { %351 = vsyncpa [#allocation5], 1 }
  0xcc   :  { %353 = vsyncpa [#allocation5 + $0x1], 1 }

</bundles_post_ra>
